<compile_context>
chip_gen: v7x
topology: tpu7x:2x2x1
jax: 0.10.0
libtpu: 0.0.40
codegen_flags: <defaults>
</compile_context>

<pallas_src>
import jax
import jax.numpy as jnp
from jax.experimental import pallas as pl
from jax.experimental.pallas import tpu as pltpu


def stage_recommender_kernel(ids_ref, m_ref, b1_ref, w2_ref, b2_ref, out_ref):
    # ids_ref: (2, TB)  int32   row 0 = winner ids, row 1 = loser ids
    # m_ref:   (Hp, 2*Cp)       folded (embedding @ fc1) weight, hidden-major
    # b1_ref:  (Hp, 1)  f32
    # w2_ref:  (Sp, Hp)         fc2 weight, transposed (stage-major)
    # b2_ref:  (Sp, 1)  f32
    # out_ref: (Sp, TB) f32     batch on lanes -> lane-dense store
    tb = ids_ref.shape[1]
    two_cp = m_ref.shape[1]
    cp = two_cp // 2

    ids = ids_ref[...]
    winner = ids[0:1, :]                                   # (1, TB)
    loser = ids[1:2, :]                                    # (1, TB)

    # Combined [winner | loser] one-hot along the contraction (sublane) axis,
    # built with one OR of two compares (cheaper on the VPU than where/select).
    row = jax.lax.broadcasted_iota(jnp.int32, (two_cp, tb), 0)
    onehot = ((row == winner) | (row == (loser + cp))).astype(m_ref.dtype)

    # fc1 (embedding gather folded into the weight) + bias + ReLU.
    h = (jnp.dot(m_ref[...], onehot, preferred_element_type=jnp.float32)
         + b1_ref[...])                                    # (Hp, TB)
    h = jnp.maximum(h, 0.0)

    # fc2 + bias.
    out_ref[...] = (jnp.dot(w2_ref[...], h.astype(w2_ref.dtype),
                            preferred_element_type=jnp.float32)
                    + b2_ref[...])                         # (Sp, TB)


def _round_up(x, m):
    return (x + m - 1) // m * m


def _choose_tb(B, tb):
    """Batch-tile choice: lane-dense multiples of 128 for B>=128, and keep the
    grid at >=2 blocks when the batch allows it (v7x megacore split)."""
    if B >= 128:
        n128 = _round_up(B, 128) // 128
        tiles = max(1, min(max(tb // 128, 1), (n128 + 1) // 2))
        return tiles * 128
    return _round_up(B, 8)


def fold_stage_recommender_params(emb, w1, b1, w2, b2, *,
                                  matmul_dtype=jnp.float32):
    """Weight-only precompute (fold embedding into fc1, transpose, pad).

    Call once per parameter set (inference) and reuse across batches; the
    per-call hot path is then just the ids transpose + one pallas_call.
    Use matmul_dtype=jnp.bfloat16 for native-rate MXU on v5e/v6e/v7x.
    """
    f32 = jnp.float32
    hi = jax.lax.Precision.HIGHEST
    C, E = emb.shape
    H = w1.shape[1]
    S = w2.shape[1]

    Cp = _round_up(C, 32)              # 2*Cp = one-hot contraction dim (mult of 64)
    Hp = _round_up(H, 8)               # sublane axis: multiple of 8 suffices
    Sp = _round_up(S, 8)

    m_w = jnp.dot(emb.astype(f32), w1[:E].astype(f32), precision=hi)   # (C, H)
    m_l = jnp.dot(emb.astype(f32), w1[E:].astype(f32), precision=hi)   # (C, H)
    m_cat = jnp.zeros((Hp, 2 * Cp), f32)
    m_cat = m_cat.at[:H, :C].set(m_w.T).at[:H, Cp:Cp + C].set(m_l.T)
    b1_col = jnp.zeros((Hp, 1), f32).at[:H, 0].set(jnp.reshape(b1, (-1,)).astype(f32))
    w2_t = jnp.zeros((Sp, Hp), f32).at[:S, :H].set(w2.T.astype(f32))
    b2_col = jnp.zeros((Sp, 1), f32).at[:S, 0].set(jnp.reshape(b2, (-1,)).astype(f32))

    m_cat = m_cat.astype(matmul_dtype)
    w2_t = w2_t.astype(matmul_dtype)
    return m_cat, b1_col, w2_t, b2_col, S


def stage_recommender_apply(ids, folded, *, tb=2048):
    """Run the kernel on a batch of (winner, loser) id pairs.

    ids: (B, 2) int32. Returns (B, S) float32 logits.
    """
    m_cat, b1_col, w2_t, b2_col, S = folded
    f32 = jnp.float32
    B = ids.shape[0]
    Hp, two_cp = m_cat.shape
    Sp = w2_t.shape[0]

    TB = _choose_tb(B, tb)
    Bp = _round_up(B, TB)

    # Batch on the lane axis: ids transposed to (2, Bp); padded columns use
    # character 0 (a valid id) and their outputs are sliced off below.
    ids_t = jnp.zeros((2, Bp), jnp.int32).at[:, :B].set(ids.astype(jnp.int32).T)

    grid = (Bp // TB,)
    out_t = pl.pallas_call(
        stage_recommender_kernel,
        out_shape=jax.ShapeDtypeStruct((Sp, Bp), f32),
        grid=grid,
        in_specs=[
            pl.BlockSpec((2, TB), lambda i: (0, i)),        # ids (tiny, lane-dense)
            pl.BlockSpec((Hp, two_cp), lambda i: (0, 0)),   # folded emb@fc1 weight
            pl.BlockSpec((Hp, 1), lambda i: (0, 0)),        # fc1 bias
            pl.BlockSpec((Sp, Hp), lambda i: (0, 0)),       # fc2 weight (transposed)
            pl.BlockSpec((Sp, 1), lambda i: (0, 0)),        # fc2 bias
        ],
        out_specs=pl.BlockSpec((Sp, TB), lambda i: (0, i)),
        compiler_params=pltpu.CompilerParams(
            dimension_semantics=("parallel",)),             # megacore on v7x
    )(ids_t, m_cat, b1_col, w2_t, b2_col)

    # NOTE(perf): this slice+transpose is a separate XLA op; consumers that can
    # accept (S, B) should use `out_t[:S, :B]` directly.
    return out_t[:S, :B].T


def stage_recommender(ids, emb, w1, b1, w2, b2, *, tb=2048,
                      matmul_dtype=jnp.float32):
    """Convenience wrapper: fold params and apply (matches PyTorch forward)."""
    folded = fold_stage_recommender_params(emb, w1, b1, w2, b2,
                                           matmul_dtype=matmul_dtype)
    return stage_recommender_apply(ids, folded, tb=tb)


def stage_recommender_ref(ids, emb, w1, b1, w2, b2):
    # Pure-JAX reference mirroring the PyTorch forward (high-precision dots).
    hi = jax.lax.Precision.HIGHEST
    w_emb = emb[ids[:, 0]]
    l_emb = emb[ids[:, 1]]
    x = jnp.concatenate([w_emb, l_emb], axis=1)
    h = jnp.maximum(jnp.dot(x, w1, precision=hi) + jnp.reshape(b1, (1, -1)), 0.0)
    return jnp.dot(h, w2, precision=hi) + jnp.reshape(b2, (1, -1))


if __name__ == "__main__":
    num_characters = 26
    num_stages = 6
    embedding_dim = 16

    key = jax.random.PRNGKey(0)
    k_emb, k_w1, k_b1, k_w2, k_b2, k_ids = jax.random.split(key, 6)

    # Deterministic synthetic parameters (shapes match nn.Embedding / nn.Linear).
    emb = jax.random.normal(k_emb, (num_characters, embedding_dim), jnp.float32)
    w1 = jax.random.normal(k_w1, (embedding_dim * 2, 64), jnp.float32) * 0.1
    b1 = jax.random.normal(k_b1, (1, 64), jnp.float32) * 0.1
    w2 = jax.random.normal(k_w2, (64, num_stages), jnp.float32) * 0.1
    b2 = jax.random.normal(k_b2, (1, num_stages), jnp.float32) * 0.1

    # Fold the weights once (inference-style caching of the precompute).
    folded = fold_stage_recommender_params(emb, w1, b1, w2, b2)

    # Case 1: tiny batch (single grid step, block == full batch, masked store OK).
    ids_small = jax.random.randint(k_ids, (8, 2), 0, num_characters, jnp.int32)
    out_small = jax.block_until_ready(stage_recommender_apply(ids_small, folded))
    ref_small = stage_recommender_ref(ids_small, emb, w1, b1, w2, b2)
    assert out_small.shape == (8, num_stages)
    assert jnp.allclose(out_small, ref_small, atol=2e-3, rtol=2e-3)

    # Case 2: non-multiple batch -> padded to 128-multiple tiles, 2-block
    # parallel grid (TB auto-chosen = 128 so both v7x TensorCores get work).
    ids_big = jax.random.randint(jax.random.PRNGKey(1), (200, 2), 0,
                                 num_characters, jnp.int32)
    out_big = jax.block_until_ready(stage_recommender_apply(ids_big, folded))
    ref_big = stage_recommender_ref(ids_big, emb, w1, b1, w2, b2)
    assert out_big.shape == (200, num_stages)
    assert jnp.allclose(out_big, ref_big, atol=2e-3, rtol=2e-3)

    # Case 3: one-shot convenience wrapper (fold + apply in a single call).
    out_once = jax.block_until_ready(
        stage_recommender(ids_small, emb, w1, b1, w2, b2))
    assert jnp.allclose(out_once, ref_small, atol=2e-3, rtol=2e-3)

    print("KERNEL_OK")
</pallas_src>

<mosaic_0001>
module attributes {stable_mosaic.version = 11 : i64} {
  func.func @stage_recommender_kernel(%arg0: i32, %arg1: memref<2x8xi32, #tpu.memory_space<vmem>>, %arg2: memref<64x64xf32, #tpu.memory_space<vmem>>, %arg3: memref<64x1xf32, #tpu.memory_space<vmem>>, %arg4: memref<8x64xf32, #tpu.memory_space<vmem>>, %arg5: memref<8x1xf32, #tpu.memory_space<vmem>>, %arg6: memref<8x8xf32, #tpu.memory_space<vmem>>) attributes {dimension_semantics = [#tpu.dimension_semantics<parallel>], iteration_bounds = array<i64: 1>, scalar_prefetch = 0 : i64, scratch_operands = 0 : i64, tpu.core_type = #tpu.core_type<tc>, window_params = [{transform_indices = @transform_0, window_bounds = array<i64: 2, 8>}, {pipeline_mode = #tpu.pipeline_mode<synchronous>, transform_indices = @transform_1, window_bounds = array<i64: 64, 64>}, {pipeline_mode = #tpu.pipeline_mode<synchronous>, transform_indices = @transform_2, window_bounds = array<i64: 64, 1>}, {pipeline_mode = #tpu.pipeline_mode<synchronous>, transform_indices = @transform_3, window_bounds = array<i64: 8, 64>}, {pipeline_mode = #tpu.pipeline_mode<synchronous>, transform_indices = @transform_4, window_bounds = array<i64: 8, 1>}, {transform_indices = @transform_5, window_bounds = array<i64: 8, 8>}]} {
    %c0 = arith.constant 0 : index
    %c0_0 = arith.constant 0 : index
    %0 = vector.load %arg1[%c0, %c0_0] : memref<2x8xi32, #tpu.memory_space<vmem>>, vector<2x8xi32>
    %1 = vector.extract_strided_slice %0 {offsets = [0, 0], sizes = [1, 8], strides = [1, 1]} : vector<2x8xi32> to vector<1x8xi32>
    %2 = vector.extract_strided_slice %0 {offsets = [1, 0], sizes = [1, 8], strides = [1, 1]} : vector<2x8xi32> to vector<1x8xi32>
    %3 = tpu.iota {dimensions = array<i32: 0>} : vector<64x8xi32>
    %4 = vector.broadcast %1 : vector<1x8xi32> to vector<64x8xi32>
    %5 = arith.cmpi eq, %3, %4 : vector<64x8xi32>
    %c32_i32 = arith.constant 32 : i32
    %6 = vector.broadcast %c32_i32 : i32 to vector<1x8xi32>
    %7 = arith.addi %2, %6 : vector<1x8xi32>
    %8 = vector.broadcast %7 : vector<1x8xi32> to vector<64x8xi32>
    %9 = arith.cmpi eq, %3, %8 : vector<64x8xi32>
    %10 = arith.ori %5, %9 : vector<64x8xi1>
    %11 = arith.extui %10 : vector<64x8xi1> to vector<64x8xi32>
    %12 = arith.sitofp %11 : vector<64x8xi32> to vector<64x8xf32>
    %c0_1 = arith.constant 0 : index
    %c0_2 = arith.constant 0 : index
    %13 = vector.load %arg2[%c0_1, %c0_2] : memref<64x64xf32, #tpu.memory_space<vmem>>, vector<64x64xf32>
    %cst = arith.constant dense<0.000000e+00> : vector<64x8xf32>
    %14 = tpu.matmul %13, %12, %cst {dimension_numbers = #tpu.dot_dimension_numbers<[1], [0], [0], [1], [0, 0, 1, 1], [], []>} : vector<64x64xf32>, vector<64x8xf32>, vector<64x8xf32> -> vector<64x8xf32>
    %c0_3 = arith.constant 0 : index
    %c0_4 = arith.constant 0 : index
    %15 = vector.load %arg3[%c0_3, %c0_4] : memref<64x1xf32, #tpu.memory_space<vmem>>, vector<64x1xf32>
    %16 = vector.broadcast %15 : vector<64x1xf32> to vector<64x8xf32>
    %17 = arith.addf %14, %16 : vector<64x8xf32>
    %cst_5 = arith.constant 0.000000e+00 : f32
    %18 = vector.broadcast %cst_5 : f32 to vector<64x8xf32>
    %19 = arith.maximumf %17, %18 : vector<64x8xf32>
    %c0_6 = arith.constant 0 : index
    %c0_7 = arith.constant 0 : index
    %20 = vector.load %arg4[%c0_6, %c0_7] : memref<8x64xf32, #tpu.memory_space<vmem>>, vector<8x64xf32>
    %cst_8 = arith.constant dense<0.000000e+00> : vector<8x8xf32>
    %21 = tpu.matmul %20, %19, %cst_8 {dimension_numbers = #tpu.dot_dimension_numbers<[1], [0], [0], [1], [0, 0, 1, 1], [], []>} : vector<8x64xf32>, vector<64x8xf32>, vector<8x8xf32> -> vector<8x8xf32>
    %c0_9 = arith.constant 0 : index
    %c0_10 = arith.constant 0 : index
    %22 = vector.load %arg5[%c0_9, %c0_10] : memref<8x1xf32, #tpu.memory_space<vmem>>, vector<8x1xf32>
    %23 = vector.broadcast %22 : vector<8x1xf32> to vector<8x8xf32>
    %24 = arith.addf %21, %23 : vector<8x8xf32>
    %c0_11 = arith.constant 0 : index
    %c0_12 = arith.constant 0 : index
    %25 = vector.load %arg6[%c0_11, %c0_12] : memref<8x8xf32, #tpu.memory_space<vmem>>, vector<8x8xf32>
    tpu.vector_store %arg6[%c0_11, %c0_12], %24 {strides = array<i32>} : memref<8x8xf32, #tpu.memory_space<vmem>>, vector<8x8xf32>,
    return
  }
  func.func @transform_0(%arg0: i32) -> (i32, i32) {
    %c0_i32 = arith.constant 0 : i32
    %c0_i32_0 = arith.constant 0 : i32
    return %c0_i32, %arg0 : i32, i32
  }
  func.func @transform_1(%arg0: i32) -> (i32, i32) {
    %c0_i32 = arith.constant 0 : i32
    %c0_i32_0 = arith.constant 0 : i32
    %c0_i32_1 = arith.constant 0 : i32
    return %c0_i32, %c0_i32_0 : i32, i32
  }
  func.func @transform_2(%arg0: i32) -> (i32, i32) {
    %c0_i32 = arith.constant 0 : i32
    %c0_i32_0 = arith.constant 0 : i32
    %c0_i32_1 = arith.constant 0 : i32
    return %c0_i32, %c0_i32_0 : i32, i32
  }
  func.func @transform_3(%arg0: i32) -> (i32, i32) {
    %c0_i32 = arith.constant 0 : i32
    %c0_i32_0 = arith.constant 0 : i32
    %c0_i32_1 = arith.constant 0 : i32
    return %c0_i32, %c0_i32_0 : i32, i32
  }
  func.func @transform_4(%arg0: i32) -> (i32, i32) {
    %c0_i32 = arith.constant 0 : i32
    %c0_i32_0 = arith.constant 0 : i32
    %c0_i32_1 = arith.constant 0 : i32
    return %c0_i32, %c0_i32_0 : i32, i32
  }
  func.func @transform_5(%arg0: i32) -> (i32, i32) {
    %c0_i32 = arith.constant 0 : i32
    %c0_i32_0 = arith.constant 0 : i32
    return %c0_i32, %arg0 : i32, i32
  }
}

</mosaic_0001>

<bundles_post_ra>
// kernel: tpu_custom_call.1
= control target key start
LH: loop header
LB: loop body
LE: loop exit
PB: predicated region body
PF: predicated region fallthrough
CT: control target
= control target key end

     0   :  { %v22_v1 = vlaneseq  ;;  %vm136_vm0 = vcmask 523264   ;;  %v527_v5 = vmov 0   ;;  %s665_s0 = inlined_call_operand.vmem [shape: s32[2,8], index: 0, kind: input, shape index: {}]   ;;  %s666_s1 = inlined_call_operand.vmem [shape: f32[64,64], index: 1, kind: input, shape index: {}]   ;;  %s667_s2 = inlined_call_operand.vmem [shape: f32[64,1], index: 2, kind: input, shape index: {}]   ;;  %s668_s3 = inlined_call_operand.vmem [shape: f32[8,64], index: 3, kind: input, shape index: {}]   ;;  %s669_s4 = inlined_call_operand.vmem [shape: f32[8,1], index: 4, kind: input, shape index: {}]   ;;  %s670_s5 = inlined_call_operand.hbm [shape: f32[8,8], index: 5, kind: output, shape index: {}]  }
   0x1   :  { %v21_v0 = vld [vmem:[%s665_s0] sm:$0x3]  ;;  %501 = vset.pattern.permute.xlu0 %v527_v5  ;;  %502 = vset.pattern.permute.xlu1 %v527_v5  ;;  %v90_v10 = vld [vmem:[%s667_s2 + $0x10] sm:$0xff]  ;;  %v89_v12 = vld [vmem:[%s667_s2 + $0x8] sm:$0xff] }
   0x2   :  { %v80_v2 = vld [vmem:[%s666_s1] sm:$0xff]  ;;  %v23_v3 = vshrl.u32 %v22_v1, 7  ;;  %v43_v4 = vadd.s32 32, %v21_v0  ;;  %108 = vperm.xlu1 %502, %v90_v10   ;;  %v91_v16 = vld [vmem:[%s667_s2 + $0x18] sm:$0xff] }
   0x3   :  { %436 = vmatprep.mubr.msk.f32.mxu0 %vm136_vm0, %v80_v2  ;;  %v88_v6 = vld [vmem:[%s667_s2] sm:$0xff] }
   0x4   :  { %v24_v7 = vadd.s32 8, %v23_v3  ;;  %v33_v8 = vsub.s32 0, %v23_v3  ;;  %v46_v9 = vsub.s32 1, %v23_v3  ;;  %98 = vperm.xlu0 %501, %v88_v6   ;;  %v25_v11 = vadd.s32 16, %v23_v3 }
   0x5   :  { %v26_v15 = vadd.s32 24, %v23_v3  ;;  %v27_v17 = vadd.s32 32, %v23_v3 }
   0x6   :  { %v34_v13 = vrot.slane %v21_v0, %v33_v8  ;;  %v47_v14 = vrot.slane %v43_v4, %v46_v9 }
   0x7   :  { %10 = vsyncpa [#allocation3], 0  ;;  %v28_v19 = vadd.s32 40, %v23_v3  ;;  %v92_v20 = vld [vmem:[%s667_s2 + $0x20] sm:$0xff]  ;;  %113 = vperm.xlu1 %502, %v91_v16   ;;  %v93_v21 = vld [vmem:[%s667_s2 + $0x28] sm:$0xff]  ;;  %v29_v22 = vadd.s32 48, %v23_v3 }
   0x8   :  { %vm35_vm1 = vcmp.eq.s32.totalorder %v23_v3, %v34_v13  ;;  %vm36_vm2 = vcmp.eq.s32.totalorder %v24_v7, %v34_v13  ;;  %vm48_vm3 = vcmp.eq.s32.totalorder %v23_v3, %v47_v14  ;;  %vm49_vm4 = vcmp.eq.s32.totalorder %v24_v7, %v47_v14  ;;  %103 = vperm.xlu0 %501, %v89_v12   ;;  %v94_v27 = vld [vmem:[%s667_s2 + $0x30] sm:$0xff]  ;;  %v95_v28 = vld [vmem:[%s667_s2 + $0x38] sm:$0xff]  ;;  %v275_v30 = vld [vmem:[%s669_s4] sm:$0xff]  ;;  %s532_s26 = smov [#allocation2]  }
   0x9   :  { %vm582_vm5 = vmor %vm35_vm1, %vm48_vm3  ;;  %vm37_vm6 = vcmp.eq.s32.totalorder %v25_v11, %v34_v13  ;;  %vm50_vm7 = vcmp.eq.s32.totalorder %v25_v11, %v47_v14  ;;  %vm38_vm9 = vcmp.eq.s32.totalorder %v26_v15, %v34_v13  ;;  %vm51_vm10 = vcmp.eq.s32.totalorder %v26_v15, %v47_v14  ;;  %v81_v31 = vld [vmem:[%s666_s1 + $0x8] sm:$0xff]  ;;  %v82_v32 = vld [vmem:[%s666_s1 + $0x10] sm:$0xff]  ;;  %s362_s27 = sshll.u32 %s532_s26, 4  ;;  %s363_s27 = int_to_ptr.vmem [resolvable:$true] %s362_s27 }
   0xa   :  { %vm57_vm8 = vmor %vm36_vm2, %vm49_vm4  ;;  %v528_v23 = vmov 1.0|1.0   ;;  %vm39_vm13 = vcmp.eq.s32.totalorder %v27_v17, %v34_v13  ;;  %vm52_vm14 = vcmp.eq.s32.totalorder %v27_v17, %v47_v14  ;;  %v30_v25 = vadd.s32 56, %v23_v3  ;;  %v83_v33 = vld [vmem:[%s666_s1 + $0x18] sm:$0xff]  ;;  %v84_v34 = vld [vmem:[%s666_s1 + $0x20] sm:$0xff]  ;;  %s503_s28 = scalar_lea.vmem %s363_s27, 128  ;;  %p508_p1 = scmp.lt.s32.totalorder %s363_s27, %s363_s27 }
   0xb   :  { %vm467_vm11 = vmpackc.low %vm57_vm8, %vm582_vm5  ;;  %vm40_vm1 = vcmp.eq.s32.totalorder %v28_v19, %v34_v13  ;;  %vm53_vm2 = vcmp.eq.s32.totalorder %v28_v19, %v47_v14  ;;  %123 = vperm.xlu1 %502, %v93_v21   ;;  %vm41_vm5 = vcmp.eq.s32.totalorder %v29_v22, %v34_v13  ;;  %v85_v35 = vld [vmem:[%s666_s1 + $0x28] sm:$0xff]  ;;  %v86_v36 = vld [vmem:[%s666_s1 + $0x30] sm:$0xff]  ;;  %v529_v38 = vmov 0.0|0.0   ;;  %p504_p0 = scmp.ne.s32.totalorder %s363_s27, %s503_s28  ;;  %p509_p2 = scmp.lt.s32.totalorder %s503_s28, %s503_s28 }
   0xc   :  { %468 = vmatprep.subr.msk.bf16.mxu0 %vm467_vm11, %v528_v23  ;;  %vm594_vm12 = vmor %vm37_vm6, %vm50_vm7  ;;  %118 = vperm.xlu0 %501, %v92_v20   ;;  %vm54_vm6 = vcmp.eq.s32.totalorder %v29_v22, %v47_v14  ;;  %vm42_vm8 = vcmp.eq.s32.totalorder %v30_v25, %v34_v13  ;;  %v87_v37 = vld [vmem:[%s666_s1 + $0x38] sm:$0xff]  ;;  %v531_v39 = vmov 0.0   ;;  %v274_v12 = vld [vmem:[%s668_s3] sm:$0xff] }
   0xd   :  { %470 = vmatpush3.bf16.msk.msra.mxu0 %vm467_vm11, %v528_v23  ;;  %vm598_vm15 = vmor %vm38_vm9, %vm51_vm10  ;;  %vm55_vm9 = vcmp.eq.s32.totalorder %v30_v25, %v47_v14  ;;  %483 = vmatprep.subr.bf16.mxu1 %v529_v38  ;;  %p510_p3 = por %p509_p2, %p508_p1 }
   0xe   :  { %vm471_vm3 = vmpackc.low %vm598_vm15, %vm594_vm12  ;;  %vm354_vm15 = vcmask 64512  }
   0xf   :  { %472 = vmatprep.subr.msk.bf16.mxu0 %vm471_vm3, %v528_v23  ;;  %vm612_vm4 = vmor %vm39_vm13, %vm52_vm14  ;;  %133 = vperm.xlu1 %502, %v95_v28   ;;  %vm530_vm14 = vmmov 0   ;;  %p511_p4 = pnand %p510_p3, %p504_p0 }
  0x10   :  { %vm61_vm7 = vmor %vm40_vm1, %vm53_vm2  ;;  %128 = vperm.xlu0 %501, %v94_v27   ;;  %464 = vmatprep.mubr.msk.f32.mxu1 %vm530_vm14, %v531_v39 }
  0x11   :  { %474 = vmatpush3.bf16.msk.msra.mxu0 %vm471_vm3, %v528_v23  ;;  %vm475_vm10 = vmpackc.low %vm61_vm7, %vm612_vm4 }
  0x12   :  { %476 = vmatprep.subr.msk.bf16.mxu0 %vm475_vm10, %v528_v23  ;;  %vm62_vm11 = vmor %vm41_vm5, %vm54_vm6 }
  0x13   :  { %vm63_vm12 = vmor %vm42_vm8, %vm55_vm9 }
  0x14   :  { %vm479_vm13 = vmpackc.low %vm63_vm12, %vm62_vm11  ;;  %278 = vperm.xlu0 %501, %v275_v30  }
  0x15   :  { %478 = vmatpush3.bf16.msk.msra.mxu0 %vm475_vm10, %v528_v23 }
  0x16   :  { %480 = vmatprep.subr.msk.bf16.mxu0 %vm479_vm13, %v528_v23 }
  0x19   :  { %482 = vmatpush3.bf16.msk.msra.mxu0 %vm479_vm13, %v528_v23 }
  0x1c   :  { %437 = vmatmul.mubr.msk.f32.vlgmr.msra.gmra.mrb[0].mxu0 %vm136_vm0, %v81_v31 }
  0x1d   :  { %439 = vmatprep.mubr.msk.f32.mxu0 %vm136_vm0, %v82_v32 }
  0x20   :  { %440 = vmatmul.mubr.msk.f32.gmra.mrb[2].mxu0 %vm136_vm0, %v83_v33 }
  0x21   :  { %442 = vmatprep.mubr.msk.f32.mxu0 %vm136_vm0, %v84_v34 }
  0x24   :  { %443 = vmatmul.mubr.msk.f32.gmra.mrb[4].mxu0 %vm136_vm0, %v85_v35 }
  0x25   :  { %445 = vmatprep.mubr.msk.f32.mxu0 %vm136_vm0, %v86_v36 }
  0x28   :  { %446 = vmatmul.mubr.msk.f32.gmra.mrb[6].mxu0 %vm136_vm0, %v87_v37 }
  0x81   :  { %v109_v41 = vpop.permute.xlu1 %108 }
  0x83   :  { %v99_v40 = vpop.permute.xlu0 %98 }
  0x86   :  { %v114_v43 = vpop.permute.xlu1 %113 }
  0x87   :  { %v104_v42 = vpop.permute.xlu0 %103 }
  0x8a   :  { %v124_v53 = vpop.permute.xlu1 %123 }
  0x8b   :  { %v119_v56 = vpop.permute.xlu0 %118 }
  0x8e   :  { %v134_v1 = vpop.permute.xlu1 %133 }
  0x8f   :  { %v129_v4 = vpop.permute.xlu0 %128 }
  0x93   :  { %v279_v13 = vpop.permute.xlu0 %278 }
  0xef   :  { %v438_v44 = vpop.f32.mrb[0].mxu0 }
  0xf0   :  { %v233_v45 = vadd.f32 %v438_v44, %v104_v42  ;;  %v227_v46 = vpop.f32.mrb[1].mxu0 }
  0xf1   :  { %v228_v47 = vadd.f32 %v227_v46, %v99_v40 }
  0xf2   :  { %v267_v48 = vmax.f32 %v233_v45, 0.0 }
  0xf3   :  { %v266_v49 = vmax.f32 %v228_v47, 0.0  ;;  %v441_v50 = vpop.f32.mrb[2].mxu0 }
  0xf4   :  { %v243_v51 = vadd.f32 %v441_v50, %v114_v43  ;;  %v237_v52 = vpop.f32.mrb[3].mxu0 }
  0xf5   :  { %v238_v54 = vadd.f32 %v237_v52, %v109_v41  ;;  %v484_v55 = vpack.c.bf16 %v267_v48, %v266_v49 }
  0xf6   :  { %v269_v57 = vmax.f32 %v243_v51, 0.0 }
  0xf7   :  { %v268_v58 = vmax.f32 %v238_v54, 0.0  ;;  %v444_v59 = vpop.f32.mrb[4].mxu0  ;;  %485 = vmatpush3.bf16.msra.mxu1 %v484_v55 }
  0xf8   :  { %v253_v60 = vadd.f32 %v444_v59, %v124_v53  ;;  %v247_v61 = vpop.f32.mrb[5].mxu0  ;;  %486 = vmatprep.subr.bf16.mxu1 %v529_v38 }
  0xf9   :  { %v487_v62 = vpack.c.bf16 %v269_v57, %v268_v58  ;;  %v248_v63 = vadd.f32 %v247_v61, %v119_v56 }
  0xfa   :  { %v271_v0 = vmax.f32 %v253_v60, 0.0 }
  0xfb   :  { %v270_v2 = vmax.f32 %v248_v63, 0.0  ;;  %v447_v3 = vpop.f32.mrb[6].mxu0  ;;  %488 = vmatpush3.bf16.msra.mxu1 %v487_v62 }
  0xfc   :  { %v263_v5 = vadd.f32 %v447_v3, %v134_v1  ;;  %v257_v6 = vpop.f32.mrb[7].mxu0  ;;  %489 = vmatprep.subr.bf16.mxu1 %v529_v38 }
  0xfd   :  { %v490_v7 = vpack.c.bf16 %v271_v0, %v270_v2  ;;  %v258_v8 = vadd.f32 %v257_v6, %v129_v4 }
  0xfe   :  { %v273_v9 = vmax.f32 %v263_v5, 0.0 }
  0xff   :  { %v272_v10 = vmax.f32 %v258_v8, 0.0  ;;  %491 = vmatpush3.bf16.msra.mxu1 %v490_v7 }
 0x100   :  { %492 = vmatprep.subr.bf16.mxu1 %v529_v38 }
 0x101   :  { %v493_v11 = vpack.c.bf16 %v273_v9, %v272_v10 }
 0x103   :  { %494 = vmatpush3.bf16.msra.mxu1 %v493_v11 }
 0x106   :  { %465 = vmatmul.mubr.msk.f32.vlgmr.msra.gmra.mrb[0].mxu1 %vm136_vm0, %v274_v12 }
 0x1d9   :  { %v350_v14 = vpop.f32.mrb[0].mxu1 }
 0x1da   :  { %v351_v15 = vadd.f32 %v350_v14, %v279_v13  ;;  %v466_v16 = vpop.f32.mrb[1].mxu1 }
 0x1dc   :  { %355 = vst.msk [vmem:[#allocation2] sm:$0xff] %vm354_vm15, %v351_v15 }
 0x1dd   :  { %514 = shalt.err (!%p511_p4)
}
 0x1de   :  { %s515_s30 = scalar_lea.hbm %s670_s5, 128 }
 0x1df   :  { %p516_p5 = scmp.ne.s32.totalorder %s670_s5, %s515_s30  ;;  %p519_p6 = scmp.lt.u32.totalorder %s515_s30, %s670_s5 }
 0x1e1   :  { %p521_p7 = pnand %p519_p6, %p516_p5 }
 0x1e3   :  { %524 = shalt.err (!%p521_p7)
}
 0x1e4   :  { %365 = dma.vmem_to_hbm [thread:$0]  %s363_s27, 128, %s670_s5, [#allocation3]  }
 0x1e5   :  { %525 = dma.done.wait [#allocation3], 128  }
 0x1e6   :  { %526 = vsyncadd [#allocation3], 4294967168 }
 0x1e7   :  { %369 = vsyncpa [#allocation3], 1 }

</bundles_post_ra>
